<compile_context>
chip_gen: v7x
topology: tpu7x:2x2x1
jax: 0.10.0
libtpu: 0.0.40
codegen_flags: <defaults>
</compile_context>

<pallas_src>
import jax
import jax.numpy as jnp
from jax.experimental import pallas as pl
from jax.experimental.pallas import tpu as pltpu

_NEG_SLOPE = 0.1  # nn.LeakyReLU(0.1) in ZeroConv2d


def _leaky_relu(x, slope=_NEG_SLOPE):
    return jnp.where(x > 0, x, slope * x)


def zero_conv2d_kernel(x_ref, w1_ref, b1_ref, w2_ref, b2_ref, o_ref):
    # x_ref : (bb, C_in, tl)   channels-first tile, L on the lane axis
    # w1_ref: (H, C_in)        conv1 weight, native (out, in) layout
    # b1_ref: (H, 1)           column bias, broadcasts over lanes
    # w2_ref: (C_out, H)       conv2 weight
    # b2_ref: (C_out, 1)
    # o_ref : (bb, C_out, tl)  lane-dense output tile
    w1 = w1_ref[...]
    b1 = b1_ref[...]
    w2 = w2_ref[...]
    b2 = b2_ref[...]
    bb = x_ref.shape[0]
    # Static unroll over the (small) batch block: each iteration is a clean
    # 2D (channels x lanes) MXU matmul pair, no in-kernel transposes.
    for b in range(bb):
        x = x_ref[b]                                                  # (C_in, tl)
        h = _leaky_relu(jnp.dot(w1, x, preferred_element_type=jnp.float32) + b1)
        y = _leaky_relu(jnp.dot(w2, h, preferred_element_type=jnp.float32) + b2)
        o_ref[b] = y.astype(o_ref.dtype)


def zero_conv2d_forward(x_ncl, w1, b1, w2, b2, *, max_tl=1024):
    """x_ncl: (B, C_in, L). Returns (B, C_out, L). Matches ZeroConv2d.forward.

    Weights/biases in PyTorch Conv2d layout with the trailing 1x1 kernel dims
    dropped: w1 (H, C_in), b1 (H,), w2 (C_out, H), b2 (C_out,).
    """
    B, C_in, L = x_ncl.shape
    H = w1.shape[0]
    C_out = w2.shape[0]

    # Pad L to a multiple of 128 so every block is lane-dense (unmasked vst).
    L_pad = ((L + 127) // 128) * 128
    x_in = x_ncl if L_pad == L else jnp.pad(
        x_ncl, ((0, 0), (0, 0), (0, L_pad - L)))

    # Pick the per-step work: ~max_tl lanes per grid step.
    #  - Large L: lane tile up to max_tl (multiple of 128 dividing L_pad), bb=1.
    #  - Small L: tile is the whole (padded) L, and bb batch rows are packed
    #    into one step so per-step overhead stays amortized.
    max_tl = max(128, (max_tl // 128) * 128)
    if L_pad >= max_tl:
        tl = max_tl
        while L_pad % tl != 0:
            tl -= 128
        bb = 1
    else:
        tl = L_pad
        bb_target = min(B, max(1, max_tl // L_pad))
        bb = 1
        for cand in range(bb_target, 0, -1):
            if B % cand == 0:
                bb = cand
                break
    n_b = B // bb
    n_l = L_pad // tl

    b1_col = b1.reshape(H, 1)
    b2_col = b2.reshape(C_out, 1)

    out = pl.pallas_call(
        zero_conv2d_kernel,
        out_shape=jax.ShapeDtypeStruct((B, C_out, L_pad), x_ncl.dtype),
        grid=(n_b, n_l),
        in_specs=[
            # x tile: bb batch rows, all input channels, tl lanes.
            pl.BlockSpec((bb, C_in, tl), lambda b, l: (b, 0, l)),
            # Weights / biases: resident (constant block index).
            pl.BlockSpec((H, C_in), lambda b, l: (0, 0)),
            pl.BlockSpec((H, 1), lambda b, l: (0, 0)),
            pl.BlockSpec((C_out, H), lambda b, l: (0, 0)),
            pl.BlockSpec((C_out, 1), lambda b, l: (0, 0)),
        ],
        out_specs=pl.BlockSpec((bb, C_out, tl), lambda b, l: (b, 0, l)),
        compiler_params=pltpu.CompilerParams(
            dimension_semantics=("parallel", "parallel")),
    )(x_in, w1, b1_col, w2, b2_col)

    return out[:, :, :L] if L_pad != L else out


def zero_conv2d_reference(x_ncl, w1, b1, w2, b2):
    """Pure-JAX reference mirroring the PyTorch forward exactly."""
    h = jnp.einsum("bcl,hc->bhl", x_ncl, w1) + b1[None, :, None]
    h = _leaky_relu(h)
    y = jnp.einsum("bhl,oh->bol", h, w2) + b2[None, :, None]
    return _leaky_relu(y)


if __name__ == "__main__":
    B, C_in, L = 2, 4, 16
    H_CH, C_out = 32, 8

    key = jax.random.PRNGKey(0)
    kx, k1, k2, k3, k4 = jax.random.split(key, 5)

    x = jax.random.normal(kx, (B, C_in, L), dtype=jnp.float32)
    # nn.Conv2d(in, out, 1) weight is (out, in, 1, 1) -> (out, in)
    w1 = 0.1 * jax.random.normal(k1, (H_CH, C_in), dtype=jnp.float32)
    b1 = 0.1 * jax.random.normal(k2, (H_CH,), dtype=jnp.float32)
    w2 = 0.1 * jax.random.normal(k3, (C_out, H_CH), dtype=jnp.float32)
    b2 = 0.1 * jax.random.normal(k4, (C_out,), dtype=jnp.float32)

    out = zero_conv2d_forward(x, w1, b1, w2, b2)
    out = jax.block_until_ready(out)

    ref = zero_conv2d_reference(x, w1, b1, w2, b2)
    assert out.shape == (B, C_out, L), out.shape
    assert jnp.allclose(out, ref, atol=1e-5, rtol=1e-5), "mismatch vs reference"

    # Exercise the large-L path (bb=1, multiple lane tiles) as well.
    L_big = 2048 + 64  # non-multiple of 128 to also hit the padding path
    x_big = jax.random.normal(kx, (B, C_in, L_big), dtype=jnp.float32)
    out_big = jax.block_until_ready(zero_conv2d_forward(x_big, w1, b1, w2, b2))
    ref_big = zero_conv2d_reference(x_big, w1, b1, w2, b2)
    assert out_big.shape == (B, C_out, L_big)
    assert jnp.allclose(out_big, ref_big, atol=1e-5, rtol=1e-5)

    # Confirm the module's actual zero-init behaviour (output == 0).
    z = jnp.zeros_like
    out_zero = jax.block_until_ready(
        zero_conv2d_forward(x, z(w1), z(b1), z(w2), z(b2)))
    assert jnp.all(out_zero == 0.0)

    print("KERNEL_OK")
</pallas_src>

<mosaic_0001>
module attributes {stable_mosaic.version = 11 : i64} {
  func.func @zero_conv2d_kernel(%arg0: i32, %arg1: i32, %arg2: memref<2x4x128xf32, #tpu.memory_space<vmem>>, %arg3: memref<32x4xf32, #tpu.memory_space<vmem>>, %arg4: memref<32x1xf32, #tpu.memory_space<vmem>>, %arg5: memref<8x32xf32, #tpu.memory_space<vmem>>, %arg6: memref<8x1xf32, #tpu.memory_space<vmem>>, %arg7: memref<2x8x128xf32, #tpu.memory_space<vmem>>) attributes {dimension_semantics = [#tpu.dimension_semantics<parallel>, #tpu.dimension_semantics<parallel>], iteration_bounds = array<i64: 1, 1>, scalar_prefetch = 0 : i64, scratch_operands = 0 : i64, tpu.core_type = #tpu.core_type<tc>, window_params = [{transform_indices = @transform_0, window_bounds = array<i64: 2, 4, 128>}, {pipeline_mode = #tpu.pipeline_mode<synchronous>, transform_indices = @transform_1, window_bounds = array<i64: 32, 4>}, {pipeline_mode = #tpu.pipeline_mode<synchronous>, transform_indices = @transform_2, window_bounds = array<i64: 32, 1>}, {pipeline_mode = #tpu.pipeline_mode<synchronous>, transform_indices = @transform_3, window_bounds = array<i64: 8, 32>}, {pipeline_mode = #tpu.pipeline_mode<synchronous>, transform_indices = @transform_4, window_bounds = array<i64: 8, 1>}, {transform_indices = @transform_5, window_bounds = array<i64: 2, 8, 128>}]} {
    %c0 = arith.constant 0 : index
    %c0_0 = arith.constant 0 : index
    %0 = vector.load %arg3[%c0, %c0_0] : memref<32x4xf32, #tpu.memory_space<vmem>>, vector<32x4xf32>
    %c0_1 = arith.constant 0 : index
    %c0_2 = arith.constant 0 : index
    %1 = vector.load %arg4[%c0_1, %c0_2] : memref<32x1xf32, #tpu.memory_space<vmem>>, vector<32x1xf32>
    %c0_3 = arith.constant 0 : index
    %c0_4 = arith.constant 0 : index
    %2 = vector.load %arg5[%c0_3, %c0_4] : memref<8x32xf32, #tpu.memory_space<vmem>>, vector<8x32xf32>
    %c0_5 = arith.constant 0 : index
    %c0_6 = arith.constant 0 : index
    %3 = vector.load %arg6[%c0_5, %c0_6] : memref<8x1xf32, #tpu.memory_space<vmem>>, vector<8x1xf32>
    %c0_7 = arith.constant 0 : index
    %c0_8 = arith.constant 0 : index
    %c0_9 = arith.constant 0 : index
    %4 = vector.load %arg2[%c0_7, %c0_8, %c0_9] : memref<2x4x128xf32, #tpu.memory_space<vmem>>, vector<1x4x128xf32>
    %5 = vector.shape_cast %4 : vector<1x4x128xf32> to vector<4x128xf32>
    %cst = arith.constant dense<0.000000e+00> : vector<32x128xf32>
    %6 = tpu.matmul %0, %5, %cst {dimension_numbers = #tpu.dot_dimension_numbers<[1], [0], [0], [1], [0, 0, 1, 1], [], []>} : vector<32x4xf32>, vector<4x128xf32>, vector<32x128xf32> -> vector<32x128xf32>
    %7 = vector.broadcast %1 : vector<32x1xf32> to vector<32x128xf32>
    %8 = arith.addf %6, %7 : vector<32x128xf32>
    %cst_10 = arith.constant 0.000000e+00 : f32
    %9 = vector.broadcast %cst_10 : f32 to vector<32x128xf32>
    %10 = arith.cmpf ogt, %8, %9 : vector<32x128xf32>
    %cst_11 = arith.constant 1.000000e-01 : f32
    %11 = vector.broadcast %cst_11 : f32 to vector<32x128xf32>
    %12 = arith.mulf %11, %8 : vector<32x128xf32>
    %13 = arith.select %10, %8, %12 : vector<32x128xi1>, vector<32x128xf32>
    %cst_12 = arith.constant dense<0.000000e+00> : vector<8x128xf32>
    %14 = tpu.matmul %2, %13, %cst_12 {dimension_numbers = #tpu.dot_dimension_numbers<[1], [0], [0], [1], [0, 0, 1, 1], [], []>} : vector<8x32xf32>, vector<32x128xf32>, vector<8x128xf32> -> vector<8x128xf32>
    %15 = vector.broadcast %3 : vector<8x1xf32> to vector<8x128xf32>
    %16 = arith.addf %14, %15 : vector<8x128xf32>
    %cst_13 = arith.constant 0.000000e+00 : f32
    %17 = vector.broadcast %cst_13 : f32 to vector<8x128xf32>
    %18 = arith.cmpf ogt, %16, %17 : vector<8x128xf32>
    %cst_14 = arith.constant 1.000000e-01 : f32
    %19 = vector.broadcast %cst_14 : f32 to vector<8x128xf32>
    %20 = arith.mulf %19, %16 : vector<8x128xf32>
    %21 = arith.select %18, %16, %20 : vector<8x128xi1>, vector<8x128xf32>
    %c0_15 = arith.constant 0 : index
    %c0_16 = arith.constant 0 : index
    %c0_17 = arith.constant 0 : index
    %22 = vector.load %arg7[%c0_15, %c0_16, %c0_17] : memref<2x8x128xf32, #tpu.memory_space<vmem>>, vector<1x8x128xf32>
    %23 = vector.shape_cast %22 : vector<1x8x128xf32> to vector<8x128xf32>
    %24 = vector.shape_cast %21 : vector<8x128xf32> to vector<1x8x128xf32>
    tpu.vector_store %arg7[%c0_15, %c0_16, %c0_17], %24 {strides = array<i32>} : memref<2x8x128xf32, #tpu.memory_space<vmem>>, vector<1x8x128xf32>,
    %c1 = arith.constant 1 : index
    %c0_18 = arith.constant 0 : index
    %c0_19 = arith.constant 0 : index
    %25 = vector.load %arg2[%c1, %c0_18, %c0_19] : memref<2x4x128xf32, #tpu.memory_space<vmem>>, vector<1x4x128xf32>
    %26 = vector.shape_cast %25 : vector<1x4x128xf32> to vector<4x128xf32>
    %cst_20 = arith.constant dense<0.000000e+00> : vector<32x128xf32>
    %27 = tpu.matmul %0, %26, %cst_20 {dimension_numbers = #tpu.dot_dimension_numbers<[1], [0], [0], [1], [0, 0, 1, 1], [], []>} : vector<32x4xf32>, vector<4x128xf32>, vector<32x128xf32> -> vector<32x128xf32>
    %28 = vector.broadcast %1 : vector<32x1xf32> to vector<32x128xf32>
    %29 = arith.addf %27, %28 : vector<32x128xf32>
    %cst_21 = arith.constant 0.000000e+00 : f32
    %30 = vector.broadcast %cst_21 : f32 to vector<32x128xf32>
    %31 = arith.cmpf ogt, %29, %30 : vector<32x128xf32>
    %cst_22 = arith.constant 1.000000e-01 : f32
    %32 = vector.broadcast %cst_22 : f32 to vector<32x128xf32>
    %33 = arith.mulf %32, %29 : vector<32x128xf32>
    %34 = arith.select %31, %29, %33 : vector<32x128xi1>, vector<32x128xf32>
    %cst_23 = arith.constant dense<0.000000e+00> : vector<8x128xf32>
    %35 = tpu.matmul %2, %34, %cst_23 {dimension_numbers = #tpu.dot_dimension_numbers<[1], [0], [0], [1], [0, 0, 1, 1], [], []>} : vector<8x32xf32>, vector<32x128xf32>, vector<8x128xf32> -> vector<8x128xf32>
    %36 = vector.broadcast %3 : vector<8x1xf32> to vector<8x128xf32>
    %37 = arith.addf %35, %36 : vector<8x128xf32>
    %cst_24 = arith.constant 0.000000e+00 : f32
    %38 = vector.broadcast %cst_24 : f32 to vector<8x128xf32>
    %39 = arith.cmpf ogt, %37, %38 : vector<8x128xf32>
    %cst_25 = arith.constant 1.000000e-01 : f32
    %40 = vector.broadcast %cst_25 : f32 to vector<8x128xf32>
    %41 = arith.mulf %40, %37 : vector<8x128xf32>
    %42 = arith.select %39, %37, %41 : vector<8x128xi1>, vector<8x128xf32>
    %c1_26 = arith.constant 1 : index
    %c0_27 = arith.constant 0 : index
    %c0_28 = arith.constant 0 : index
    %43 = vector.load %arg7[%c1_26, %c0_27, %c0_28] : memref<2x8x128xf32, #tpu.memory_space<vmem>>, vector<1x8x128xf32>
    %44 = vector.shape_cast %43 : vector<1x8x128xf32> to vector<8x128xf32>
    %45 = vector.shape_cast %42 : vector<8x128xf32> to vector<1x8x128xf32>
    tpu.vector_store %arg7[%c1_26, %c0_27, %c0_28], %45 {strides = array<i32>} : memref<2x8x128xf32, #tpu.memory_space<vmem>>, vector<1x8x128xf32>,
    return
  }
  func.func @transform_0(%arg0: i32, %arg1: i32) -> (i32, i32, i32) {
    %c0_i32 = arith.constant 0 : i32
    %c0_i32_0 = arith.constant 0 : i32
    return %arg0, %c0_i32, %arg1 : i32, i32, i32
  }
  func.func @transform_1(%arg0: i32, %arg1: i32) -> (i32, i32) {
    %c0_i32 = arith.constant 0 : i32
    %c0_i32_0 = arith.constant 0 : i32
    %c0_i32_1 = arith.constant 0 : i32
    return %c0_i32, %c0_i32_0 : i32, i32
  }
  func.func @transform_2(%arg0: i32, %arg1: i32) -> (i32, i32) {
    %c0_i32 = arith.constant 0 : i32
    %c0_i32_0 = arith.constant 0 : i32
    %c0_i32_1 = arith.constant 0 : i32
    return %c0_i32, %c0_i32_0 : i32, i32
  }
  func.func @transform_3(%arg0: i32, %arg1: i32) -> (i32, i32) {
    %c0_i32 = arith.constant 0 : i32
    %c0_i32_0 = arith.constant 0 : i32
    %c0_i32_1 = arith.constant 0 : i32
    return %c0_i32, %c0_i32_0 : i32, i32
  }
  func.func @transform_4(%arg0: i32, %arg1: i32) -> (i32, i32) {
    %c0_i32 = arith.constant 0 : i32
    %c0_i32_0 = arith.constant 0 : i32
    %c0_i32_1 = arith.constant 0 : i32
    return %c0_i32, %c0_i32_0 : i32, i32
  }
  func.func @transform_5(%arg0: i32, %arg1: i32) -> (i32, i32, i32) {
    %c0_i32 = arith.constant 0 : i32
    %c0_i32_0 = arith.constant 0 : i32
    return %arg0, %c0_i32, %arg1 : i32, i32, i32
  }
}

</mosaic_0001>

<bundles_post_ra>
// kernel: tpu_custom_call.1
= control target key start
LH: loop header
LB: loop body
LE: loop exit
PB: predicated region body
PF: predicated region fallthrough
CT: control target
= control target key end

     0   :  { %vm65_vm0 = vcmask 1043456   ;;  %vm52_vm1 = vcmask 31744   ;;  %v558_v5 = vmov 0   ;;  %s659_s0 = inlined_call_operand.vmem [shape: f32[2,4,128], index: 0, kind: input, shape index: {}]   ;;  %s660_s1 = inlined_call_operand.vmem [shape: f32[32,4], index: 1, kind: input, shape index: {}]   ;;  %s661_s2 = inlined_call_operand.vmem [shape: f32[32,1], index: 2, kind: input, shape index: {}]   ;;  %s662_s3 = inlined_call_operand.vmem [shape: f32[8,32], index: 3, kind: input, shape index: {}]   ;;  %s663_s4 = inlined_call_operand.vmem [shape: f32[8,1], index: 4, kind: input, shape index: {}]   ;;  %s664_s5 = inlined_call_operand.hbm [shape: f32[2,8,128], index: 5, kind: output, shape index: {}]  }
   0x1   :  { %v31_v0 = vld [vmem:[%s659_s0] sm:$0xf]  ;;  %v22_v2 = vld [vmem:[%s660_s1 + $0x8] sm:$0xff]  ;;  %v448_v3 = vld [vmem:[%s659_s0 + $0x4] sm:$0xf]  ;;  %532 = vset.pattern.permute.xlu0 %v558_v5 }
   0x2   :  { %v21_v1 = vld [vmem:[%s660_s1] sm:$0xff]  ;;  %475 = vmatprep.subr.msk.mxu0 %vm65_vm0, %v31_v0  ;;  %v23_v4 = vld [vmem:[%s660_s1 + $0x10] sm:$0xff] }
   0x3   :  { %477 = vmatprep.mubr.msk.f32.mxu0 %vm52_vm1, %v21_v1  ;;  %476 = vmatpush3.msk.msra.mxu0 %vm65_vm0, %v31_v0  ;;  %v25_v6 = vld [vmem:[%s661_s2] sm:$0xff]  ;;  %v27_v7 = vld [vmem:[%s661_s2 + $0x10] sm:$0xff] }
   0x4   :  { %478 = vmatmul.mubr.msk.f32.vlgmr.msra.gmra.mrb[0].mxu0 %vm52_vm1, %v22_v2  ;;  %494 = vmatprep.subr.msk.mxu0 %vm65_vm0, %v448_v3 }
   0x5   :  { %10 = vsyncpa [#allocation3], 0  ;;  %495 = vmatpush3.msk.msra.mxu0 %vm65_vm0, %v448_v3  ;;  %480 = vmatprep.mubr.msk.f32.mxu0 %vm52_vm1, %v23_v4  ;;  %v24_v8 = vld [vmem:[%s660_s1 + $0x18] sm:$0xff]  ;;  %v26_v9 = vld [vmem:[%s661_s2 + $0x8] sm:$0xff]  ;;  %v559_v12 = vmov 0.0|0.0   ;;  %vm560_vm2 = vmmov 0  }
   0x6   :  { %34 = vperm.xlu0 %532, %v25_v6   ;;  %533 = vset.pattern.permute.xlu1 %v558_v5  ;;  %v28_v10 = vld [vmem:[%s661_s2 + $0x18] sm:$0xff]  ;;  %v30_v11 = vld [vmem:[%s663_s4] sm:$0xff]  ;;  %v561_v13 = vmov 0.0   ;;  %vm171_vm9 = vcmask 261120  }
   0x7   :  { %44 = vperm.xlu1 %533, %v27_v7   ;;  %513 = vmatprep.subr.bf16.mxu1 %v559_v12  ;;  %v29_v46 = vld [vmem:[%s662_s3] sm:$0xff]  ;;  %s562_s3 = smov [#allocation2]  }
   0x8   :  { %481 = vmatmul.mubr.msk.f32.gmra.mrb[2].mxu0 %vm52_vm1, %v24_v8  ;;  %491 = vmatprep.mubr.msk.f32.mxu1 %vm560_vm2, %v561_v13  ;;  %s431_s4 = sshll.u32 %s562_s3, 4  ;;  %s432_s4 = int_to_ptr.vmem [resolvable:$true] %s431_s4 }
   0x9   :  { %496 = vmatprep.mubr.msk.f32.mxu0 %vm52_vm1, %v21_v1  ;;  %s534_s14 = scalar_lea.vmem %s432_s4, 256  ;;  %p539_p1 = scmp.lt.s32.totalorder %s432_s4, %s432_s4 }
   0xa   :  { %39 = vperm.xlu0 %532, %v26_v9   ;;  %p535_p0 = scmp.ne.s32.totalorder %s432_s4, %s534_s14  ;;  %p540_p2 = scmp.lt.s32.totalorder %s534_s14, %s534_s14 }
   0xb   :  { %49 = vperm.xlu1 %533, %v28_v10  }
   0xc   :  { %497 = vmatmul.mubr.msk.f32.vlgmr.msra.gmra.mrb[4].mxu0 %vm52_vm1, %v22_v2  ;;  %p541_p3 = por %p540_p2, %p539_p1 }
   0xd   :  { %499 = vmatprep.mubr.msk.f32.mxu0 %vm52_vm1, %v23_v4 }
   0xe   :  { %168 = vperm.xlu0 %532, %v30_v11   ;;  %p542_p4 = pnand %p541_p3, %p535_p0 }
  0x10   :  { %500 = vmatmul.mubr.msk.f32.gmra.mrb[6].mxu0 %vm52_vm1, %v24_v8 }
  0x85   :  { %v35_v14 = vpop.permute.xlu0 %34 }
  0x86   :  { %v45_v15 = vpop.permute.xlu1 %44 }
  0x89   :  { %v40_v16 = vpop.permute.xlu0 %39 }
  0x8a   :  { %v50_v23 = vpop.permute.xlu1 %49 }
  0x8d   :  { %v169_v55 = vpop.permute.xlu0 %168 }
  0xd7   :  { %v479_v17 = vpop.f32.mrb[0].mxu0 }
  0xd8   :  { %v141_v18 = vadd.f32 %v479_v17, %v40_v16  ;;  %v135_v19 = vpop.f32.mrb[1].mxu0 }
  0xd9   :  { %v136_v20 = vadd.f32 %v135_v19, %v35_v14 }
  0xda   :  { %v159_v21 = vmul.f32 0.1, %v141_v18  ;;  %vm155_vm3 = vcmp.gt.f32.partialorder %v141_v18, 0.0 }
  0xdb   :  { %v158_v22 = vmul.f32 0.1, %v136_v20  ;;  %v482_v24 = vpop.f32.mrb[2].mxu0  ;;  %vm154_vm4 = vcmp.gt.f32.partialorder %v136_v20, 0.0 }
  0xdc   :  { %v151_v25 = vadd.f32 %v482_v24, %v50_v23  ;;  %v145_v26 = vpop.f32.mrb[3].mxu0  ;;  %v163_v27 = vsel %vm155_vm3, %v141_v18, %v159_v21 }
  0xdd   :  { %v146_v28 = vadd.f32 %v145_v26, %v45_v15  ;;  %v162_v29 = vsel %vm154_vm4, %v136_v20, %v158_v22 }
  0xde   :  { %vm157_vm5 = vcmp.gt.f32.partialorder %v151_v25, 0.0  ;;  %v161_v30 = vmul.f32 0.1, %v151_v25  ;;  %v514_v31 = vpack.c.bf16 %v163_v27, %v162_v29 }
  0xdf   :  { %vm156_vm6 = vcmp.gt.f32.partialorder %v146_v28, 0.0  ;;  %v160_v32 = vmul.f32 0.1, %v146_v28  ;;  %v498_v33 = vpop.f32.mrb[4].mxu0 }
  0xe0   :  { %v326_v34 = vadd.f32 %v498_v33, %v40_v16  ;;  %515 = vmatpush3.bf16.msra.mxu1 %v514_v31  ;;  %v320_v35 = vpop.f32.mrb[5].mxu0  ;;  %v165_v36 = vsel %vm157_vm5, %v151_v25, %v161_v30 }
  0xe1   :  { %v321_v37 = vadd.f32 %v320_v35, %v35_v14  ;;  %516 = vmatprep.subr.bf16.mxu1 %v559_v12  ;;  %v164_v38 = vsel %vm156_vm6, %v146_v28, %v160_v32 }
  0xe2   :  { %vm340_vm7 = vcmp.gt.f32.partialorder %v326_v34, 0.0  ;;  %v344_v39 = vmul.f32 0.1, %v326_v34  ;;  %v517_v40 = vpack.c.bf16 %v165_v36, %v164_v38 }
  0xe3   :  { %vm339_vm8 = vcmp.gt.f32.partialorder %v321_v37, 0.0  ;;  %v343_v41 = vmul.f32 0.1, %v321_v37  ;;  %v501_v42 = vpop.f32.mrb[6].mxu0 }
  0xe4   :  { %v348_v43 = vsel %vm340_vm7, %v326_v34, %v344_v39  ;;  %v336_v44 = vadd.f32 %v501_v42, %v50_v23  ;;  %518 = vmatpush3.bf16.msra.mxu1 %v517_v40  ;;  %v330_v45 = vpop.f32.mrb[7].mxu0 }
  0xe5   :  { %v347_v47 = vsel %vm339_vm8, %v321_v37, %v343_v41  ;;  %v331_v48 = vadd.f32 %v330_v45, %v45_v15  ;;  %519 = vmatprep.subr.bf16.mxu1 %v559_v12 }
  0xe6   :  { %v520_v49 = vpack.c.bf16 %v348_v43, %v347_v47  ;;  %vm342_vm10 = vcmp.gt.f32.partialorder %v336_v44, 0.0  ;;  %v346_v50 = vmul.f32 0.1, %v336_v44 }
  0xe7   :  { %vm341_vm11 = vcmp.gt.f32.partialorder %v331_v48, 0.0  ;;  %v345_v51 = vmul.f32 0.1, %v331_v48  ;;  %492 = vmatmul.mubr.msk.f32.vlgmr.msra.gmra.mrb[0].mxu1 %vm171_vm9, %v29_v46 }
  0xe8   :  { %v350_v52 = vsel %vm342_vm10, %v336_v44, %v346_v50  ;;  %521 = vmatpush3.bf16.msra.mxu1 %v520_v49  ;;  %510 = vmatprep.mubr.msk.f32.mxu1 %vm560_vm2, %v561_v13 }
  0xe9   :  { %v349_v53 = vsel %vm341_vm11, %v331_v48, %v345_v51  ;;  %522 = vmatprep.subr.bf16.mxu1 %v559_v12 }
  0xea   :  { %v523_v54 = vpack.c.bf16 %v350_v52, %v349_v53 }
  0xec   :  { %524 = vmatpush3.bf16.msra.mxu1 %v523_v54 }
  0xef   :  { %511 = vmatmul.mubr.msk.f32.vlgmr.msra.gmra.mrb[2].mxu1 %vm171_vm9, %v29_v46 }
 0x1ba   :  { %v241_v56 = vpop.f32.mrb[0].mxu1 }
 0x1bb   :  { %v242_v57 = vadd.f32 %v241_v56, %v169_v55  ;;  %v493_v58 = vpop.f32.mrb[1].mxu1 }
 0x1bd   :  { %vm245_vm12 = vcmp.gt.f32.partialorder %v242_v57, 0.0  ;;  %v246_v59 = vmul.f32 0.1, %v242_v57 }
 0x1bf   :  { %v247_v60 = vsel %vm245_vm12, %v242_v57, %v246_v59 }
 0x1c0   :  { %248 = vst [vmem:[#allocation2] sm:$0xff] %v247_v60 }
 0x1c2   :  { %v417_v61 = vpop.f32.mrb[2].mxu1 }
 0x1c3   :  { %v418_v62 = vadd.f32 %v417_v61, %v169_v55  ;;  %v512_v63 = vpop.f32.mrb[3].mxu1 }
 0x1c5   :  { %vm421_vm13 = vcmp.gt.f32.partialorder %v418_v62, 0.0  ;;  %v422_v0 = vmul.f32 0.1, %v418_v62 }
 0x1c7   :  { %v423_v1 = vsel %vm421_vm13, %v418_v62, %v422_v0 }
 0x1c8   :  { %425 = vst [vmem:[#allocation2 + $0x8] sm:$0xff] %v423_v1 }
 0x1c9   :  { %545 = shalt.err (!%p542_p4)
}
 0x1ca   :  { %s546_s17 = scalar_lea.hbm %s664_s5, 256 }
 0x1cb   :  { %p547_p5 = scmp.ne.s32.totalorder %s664_s5, %s546_s17  ;;  %p550_p6 = scmp.lt.u32.totalorder %s546_s17, %s664_s5 }
 0x1cd   :  { %p552_p7 = pnand %p550_p6, %p547_p5 }
 0x1cf   :  { %555 = shalt.err (!%p552_p7)
}
 0x1d0   :  { %s563_s22 = smov 128   ;;  %s564_s23 = smov 8  }
 0x1d1   :  { %437 = dma.vmem_to_hbm [thread:$0]  %s432_s4, 256, %s664_s5, [#allocation3], %s563_s22, %s563_s22, %s564_s23  }
 0x1d2   :  { %556 = dma.done.wait [#allocation3], 256  }
 0x1d3   :  { %557 = vsyncadd [#allocation3], 4294967040 }
 0x1d4   :  { %441 = vsyncpa [#allocation3], 1 }

</bundles_post_ra>
